<compile_context>
chip_gen: v7x
topology: tpu7x:2x2x1
jax: 0.10.0
libtpu: 0.0.40
codegen_flags: <defaults>
</compile_context>

<pallas_src>
import functools

import jax
import jax.numpy as jnp
from jax.experimental import pallas as pl
from jax.experimental.pallas import tpu as pltpu

EPS = 1e-7  # variance clamp used by weighted_statistics_pooling


def att_stats_pool_kernel(x_ref, w1_ref, b1_ref, w2c_ref, o_ref,
                          m_ref, l_ref, s1_ref, s2_ref, *, true_t):
    t = pl.program_id(1)
    t_tile = x_ref.shape[-1]
    n_blk = t_tile // 128  # t_tile is always a multiple of 128

    @pl.when(t == 0)
    def _init():
        m_ref[...] = jnp.full_like(m_ref, -jnp.inf)
        l_ref[...] = jnp.zeros_like(l_ref)
        s1_ref[...] = jnp.zeros_like(s1_ref)
        s2_ref[...] = jnp.zeros_like(s2_ref)

    x_in = x_ref[0]                         # (C, Tt)   input dtype (f32 or bf16)
    w1 = w1_ref[...]                        # (BN, C)   matmul dtype (bf16 default)
    b1 = b1_ref[...]                        # (BN, 1)   f32
    w2c = w2c_ref[...]                      # (BN, 1)   f32 (`function` weight, pre-transposed)

    # ---- attention scores --------------------------------------------------
    # bn_function (Conv1d k=1) on the MXU in the matmul dtype, f32 accumulate;
    # tanh on the EUP.
    x_mx = x_in.astype(w1.dtype)
    h = jnp.tanh(jnp.dot(w1, x_mx, preferred_element_type=jnp.float32) + b1)  # (BN, Tt) f32
    # `function` (BN -> 1 projection) as a VPU multiply + sublane reduce.
    # The Conv1d bias b2 is dropped: softmax over T is shift invariant.
    s = jnp.sum(w2c * h, axis=0, keepdims=True)                               # (1, Tt) f32

    # Mask padded time columns (emitted only when T was padded).
    if true_t is not None:
        idx = t * t_tile + jax.lax.broadcasted_iota(jnp.int32, (1, t_tile), 1)
        s = jnp.where(idx < true_t, s, -jnp.inf)

    # ---- online softmax over the time axis ---------------------------------
    m_old = m_ref[...]                                                        # (1, 1)
    m_new = jnp.maximum(m_old, jnp.max(s, axis=-1, keepdims=True))
    alpha = jnp.exp(m_old - m_new)                                            # (1, 1)
    p = jnp.exp(s - m_new)                                                    # (1, Tt)

    # ---- streaming weighted statistics (lane-partial accumulation) ---------
    # Fold the Tt columns into 128-wide lane partials with VPU adds; the
    # single cross-lane reduce happens once per batch in the epilogue.
    x = x_in.astype(jnp.float32)                                              # (C, Tt) f32
    pk = p[:, :128]
    xk = x[:, :128]
    xpk = xk * pk
    lp, p1, p2 = pk, xpk, xk * xpk
    for k in range(1, n_blk):
        lo = k * 128
        pk = p[:, lo:lo + 128]
        xk = x[:, lo:lo + 128]
        xpk = xk * pk
        lp = lp + pk
        p1 = p1 + xpk
        p2 = p2 + xk * xpk
    l_ref[...] = alpha * l_ref[...] + lp                                      # (1, 128)
    s1_ref[...] = alpha * s1_ref[...] + p1                                    # (C, 128)
    s2_ref[...] = alpha * s2_ref[...] + p2                                    # (C, 128)
    m_ref[...] = m_new

    @pl.when(t == pl.num_programs(1) - 1)
    def _finalize():
        l = jnp.sum(l_ref[...], axis=-1, keepdims=True)                       # (1, 1)
        s1 = jnp.sum(s1_ref[...], axis=-1, keepdims=True)                     # (C, 1)
        s2 = jnp.sum(s2_ref[...], axis=-1, keepdims=True)                     # (C, 1)
        inv_l = 1.0 / l                                                       # exact; once per batch
        mean = s1 * inv_l                                                     # (C, 1)
        var = jnp.maximum(s2 * inv_l - mean * mean, EPS)
        std = jnp.sqrt(var)
        stats = jnp.concatenate([mean, std], axis=0)                          # (2C, 1)
        # Single relayout per batch: channel-in-sublane -> lane-major row.
        o_ref[...] = jnp.transpose(stats)[None, :, :]                         # (1, 1, 2C)


def _round_up(a, b):
    return (a + b - 1) // b * b


def _vmem_plan():
    """(per-step VMEM plan budget, vmem_limit_bytes) per TPU generation."""
    mib = 1 << 20
    try:
        kind = jax.devices()[0].device_kind.lower()
    except Exception:  # pragma: no cover
        kind = ""
    if "v7" in kind:
        # v7x: only 64 MiB VMEM per TensorCore -> keep the plan modest.
        return 28 * mib, 48 * mib
    if "v6" in kind:
        # v6e: 128 MiB physical; bigger tiles amortize per-step overhead.
        return 64 * mib, 100 * mib
    if "v5 lite" in kind or "v5e" in kind:
        # v5e: 128 MiB physical but only 16 MiB default scoped -> raise limit.
        return 48 * mib, 96 * mib
    # Unknown generation: conservative plan that fits everywhere.
    return 24 * mib, 48 * mib


def _pick_t_tile(T, C, BN, *, x_bytes, w_bytes, plan_bytes):
    """Largest multiple-of-128 time tile whose full per-step VMEM footprint
    (double-buffered x block + matmul/pooling intermediates + resident weights
    + accumulators + output block) fits within plan_bytes."""
    lane = 128
    cp = _round_up(max(C, 8), 8)
    bnp = _round_up(max(BN, 8), 8)
    fixed = (
        bnp * _round_up(C, lane) * w_bytes        # w1 (resident, single-buffered)
        + 2 * bnp * lane * 4                      # b1, w2c (lane-padded)
        + 2 * cp * lane * 4 + 2 * 8 * lane * 4    # S1/S2 + m/l accumulators
        + 2 * 8 * _round_up(2 * C, lane) * 4      # double-buffered output block
    )
    # Bytes per time column: double-buffered x + h/p/xp/x*xp (+ bf16 x copy).
    per_col = 2 * cp * x_bytes + 4 * (bnp + 3 * cp + 8) + 2 * cp
    budget = plan_bytes - fixed
    t_tile = max(lane, budget // per_col // lane * lane)
    return int(min(t_tile, _round_up(T, lane)))


def _pallas_forward(x, w1_c, b1_col, w2_col, *, n_t, t_tile, true_t,
                    vmem_limit, single_buffer_weights):
    B, C, _ = x.shape
    BN = w1_c.shape[0]
    kernel = functools.partial(att_stats_pool_kernel, true_t=true_t)

    if single_buffer_weights:
        # Grid-invariant weights don't need double buffering.
        def wspec(shape):
            return pl.BlockSpec(shape, lambda b, t: (0, 0),
                                pipeline_mode=pl.Buffered(1))
    else:
        def wspec(shape):
            return pl.BlockSpec(shape, lambda b, t: (0, 0))

    return pl.pallas_call(
        kernel,
        out_shape=jax.ShapeDtypeStruct((B, 1, 2 * C), jnp.float32),
        grid=(B, n_t),
        in_specs=[
            # Only x moves HBM->VMEM per T step.
            pl.BlockSpec((1, C, t_tile), lambda b, t: (b, 0, t)),
            # Weights/biases: index_map ignores (b, t) -> resident in VMEM.
            wspec((BN, C)),
            wspec((BN, 1)),
            wspec((BN, 1)),
        ],
        out_specs=pl.BlockSpec((1, 1, 2 * C), lambda b, t: (b, 0, 0)),
        scratch_shapes=[
            pltpu.VMEM((1, 1), jnp.float32),    # running max m
            pltpu.VMEM((1, 128), jnp.float32),  # lane-partial sum-of-exp l
            pltpu.VMEM((C, 128), jnp.float32),  # lane-partial S1 = sum(e*x)
            pltpu.VMEM((C, 128), jnp.float32),  # lane-partial S2 = sum(e*x^2)
        ],
        compiler_params=pltpu.CompilerParams(
            dimension_semantics=("parallel", "arbitrary"),
            vmem_limit_bytes=int(vmem_limit)),
    )(x, w1_c, b1_col, w2_col)


def att_stats_pool(x, w1, b1, w2, b2=None, *, t_tile=None,
                   matmul_dtype=jnp.bfloat16):
    """x: (B, C, T) f32 or bf16; w1: (BN, C); b1: (BN,); w2: (1, BN); b2: (1,).

    b2 is accepted for API parity but unused: softmax over T is invariant to a
    constant shift of the scores, so it cannot affect the output."""
    B, C, T = x.shape
    BN = w1.shape[0]
    plan_bytes, vmem_limit = _vmem_plan()
    if t_tile is None:
        t_tile = _pick_t_tile(T, C, BN,
                              x_bytes=jnp.dtype(x.dtype).itemsize,
                              w_bytes=jnp.dtype(matmul_dtype).itemsize,
                              plan_bytes=plan_bytes)
    assert t_tile % 128 == 0, t_tile
    n_t = pl.cdiv(T, t_tile)
    t_pad = n_t * t_tile
    if t_pad != T:
        # Ragged T: zero-pad the time axis; the kernel masks padded scores.
        x = jnp.pad(x, ((0, 0), (0, 0), (0, t_pad - T)))
        true_t = T
    else:
        true_t = None

    w1_c = w1.astype(matmul_dtype)                       # half-size resident copy
    b1_col = b1.reshape(BN, 1).astype(jnp.float32)
    w2_col = w2.reshape(BN, 1).astype(jnp.float32)       # transposed once, wrapper-side

    kwargs = dict(n_t=n_t, t_tile=t_tile, true_t=true_t, vmem_limit=vmem_limit)
    try:
        out = jax.block_until_ready(
            _pallas_forward(x, w1_c, b1_col, w2_col,
                            single_buffer_weights=True, **kwargs))
    except Exception:
        # Fallback for jax/Mosaic versions without pipeline_mode support on
        # top-level BlockSpecs (weights then use the default double buffer).
        out = _pallas_forward(x, w1_c, b1_col, w2_col,
                              single_buffer_weights=False, **kwargs)
    return out.reshape(B, 2 * C)


def att_stats_pool_ref(x, w1, b1, w2, b2):
    """Plain-JAX reference mirroring the PyTorch forward (b2 included)."""
    h = jnp.tanh(jnp.einsum("oc,bct->bot", w1, x) + b1.reshape(1, -1, 1))
    s = jnp.einsum("ij,bjt->bit", w2, h) + b2.reshape(1, 1, 1)
    w = jax.nn.softmax(s, axis=-1)
    mean = jnp.sum(x * w, axis=-1)
    var = jnp.maximum(jnp.sum(x * x * w, axis=-1) - mean * mean, EPS)
    return jnp.concatenate([mean, jnp.sqrt(var)], axis=-1)


if __name__ == "__main__":
    key = jax.random.PRNGKey(0)

    def make_params(k, C, BN):
        kw1, kb1, kw2, kb2 = jax.random.split(k, 4)
        w1 = 0.1 * jax.random.normal(kw1, (BN, C), dtype=jnp.float32)
        b1 = 0.1 * jax.random.normal(kb1, (BN,), dtype=jnp.float32)
        w2 = 0.1 * jax.random.normal(kw2, (1, BN), dtype=jnp.float32)
        b2 = 0.1 * jax.random.normal(kb2, (1,), dtype=jnp.float32)
        return w1, b1, w2, b2

    # Case 1: tiny module shapes (B=2, in=4, bn=8, T=16).  T < 128 exercises
    # the pad+mask path; f32 matmul -> tight tolerance.
    B, C, BN, T = 2, 4, 8, 16
    kx, kp, key = jax.random.split(key, 3)
    x = jax.random.normal(kx, (B, C, T), dtype=jnp.float32)
    params = make_params(kp, C, BN)
    out = jax.block_until_ready(
        att_stats_pool(x, *params, matmul_dtype=jnp.float32))
    ref = att_stats_pool_ref(x, *params)
    assert out.shape == (B, 2 * C), out.shape
    assert jnp.allclose(out, ref, atol=1e-4, rtol=1e-4), \
        float(jnp.max(jnp.abs(out - ref)))

    # Case 2: multi-step online softmax (two 128-wide T tiles), bf16 MXU matmul.
    B, C, BN, T = 2, 8, 16, 256
    kx, kp, key = jax.random.split(key, 3)
    x = jax.random.normal(kx, (B, C, T), dtype=jnp.float32)
    params = make_params(kp, C, BN)
    out = jax.block_until_ready(att_stats_pool(x, *params, t_tile=128))
    ref = att_stats_pool_ref(x, *params)
    assert out.shape == (B, 2 * C), out.shape
    assert jnp.allclose(out, ref, atol=2e-2, rtol=2e-2), \
        float(jnp.max(jnp.abs(out - ref)))

    # Case 3: bf16 x in HBM + ragged T (T=200 padded to 256), bf16 matmul.
    B, C, BN, T = 2, 8, 16, 200
    kx, kp, key = jax.random.split(key, 3)
    xb = jax.random.normal(kx, (B, C, T), dtype=jnp.float32).astype(jnp.bfloat16)
    params = make_params(kp, C, BN)
    out = jax.block_until_ready(att_stats_pool(xb, *params, t_tile=128))
    ref = att_stats_pool_ref(xb.astype(jnp.float32), *params)
    assert out.shape == (B, 2 * C), out.shape
    assert jnp.allclose(out, ref, atol=2e-2, rtol=2e-2), \
        float(jnp.max(jnp.abs(out - ref)))

    print("KERNEL_OK")
</pallas_src>

<mosaic_0001>
module attributes {stable_mosaic.version = 11 : i64} {
  func.func @att_stats_pool_kernel(%arg0: i32, %arg1: i32, %arg2: memref<1x4x128xf32, #tpu.memory_space<vmem>>, %arg3: memref<8x4xf32, #tpu.memory_space<vmem>>, %arg4: memref<8x1xf32, #tpu.memory_space<vmem>>, %arg5: memref<8x1xf32, #tpu.memory_space<vmem>>, %arg6: memref<1x1x8xf32, #tpu.memory_space<vmem>>, %arg7: memref<1x1xf32, #tpu.memory_space<vmem>>, %arg8: memref<1x128xf32, #tpu.memory_space<vmem>>, %arg9: memref<4x128xf32, #tpu.memory_space<vmem>>, %arg10: memref<4x128xf32, #tpu.memory_space<vmem>>) attributes {dimension_semantics = [#tpu.dimension_semantics<parallel>, #tpu.dimension_semantics<arbitrary>], iteration_bounds = array<i64: 2, 1>, scalar_prefetch = 0 : i64, scratch_operands = 4 : i64, tpu.core_type = #tpu.core_type<tc>, window_params = [{transform_indices = @transform_0, window_bounds = array<i64: 1, 4, 128>}, {pipeline_mode = #tpu.pipeline_mode<synchronous>, transform_indices = @transform_1, window_bounds = array<i64: 8, 4>}, {pipeline_mode = #tpu.pipeline_mode<synchronous>, transform_indices = @transform_2, window_bounds = array<i64: 8, 1>}, {pipeline_mode = #tpu.pipeline_mode<synchronous>, transform_indices = @transform_3, window_bounds = array<i64: 8, 1>}, {transform_indices = @transform_4, window_bounds = array<i64: 1, 1, 8>}]} {
    %c0_i32 = arith.constant 0 : i32
    %0 = arith.cmpi eq, %arg1, %c0_i32 : i32
    %1 = arith.extui %0 : i1 to i32
    %c0_i32_0 = arith.constant 0 : i32
    %2 = arith.cmpi ne, %1, %c0_i32_0 : i32
    scf.if %2 {
      %cst_30 = arith.constant 0xFF800000 : f32
      %55 = vector.broadcast %cst_30 : f32 to vector<1x1xf32>
      %c0_31 = arith.constant 0 : index
      %c0_32 = arith.constant 0 : index
      %56 = vector.load %arg7[%c0_31, %c0_32] : memref<1x1xf32, #tpu.memory_space<vmem>>, vector<1x1xf32>
      tpu.vector_store %arg7[%c0_31, %c0_32], %55 {strides = array<i32>} : memref<1x1xf32, #tpu.memory_space<vmem>>, vector<1x1xf32>,
      %cst_33 = arith.constant 0.000000e+00 : f32
      %57 = vector.broadcast %cst_33 : f32 to vector<1x128xf32>
      %c0_34 = arith.constant 0 : index
      %c0_35 = arith.constant 0 : index
      %58 = vector.load %arg8[%c0_34, %c0_35] : memref<1x128xf32, #tpu.memory_space<vmem>>, vector<1x128xf32>
      tpu.vector_store %arg8[%c0_34, %c0_35], %57 {strides = array<i32>} : memref<1x128xf32, #tpu.memory_space<vmem>>, vector<1x128xf32>,
      %cst_36 = arith.constant 0.000000e+00 : f32
      %59 = vector.broadcast %cst_36 : f32 to vector<4x128xf32>
      %c0_37 = arith.constant 0 : index
      %c0_38 = arith.constant 0 : index
      %60 = vector.load %arg9[%c0_37, %c0_38] : memref<4x128xf32, #tpu.memory_space<vmem>>, vector<4x128xf32>
      tpu.vector_store %arg9[%c0_37, %c0_38], %59 {strides = array<i32>} : memref<4x128xf32, #tpu.memory_space<vmem>>, vector<4x128xf32>,
      %cst_39 = arith.constant 0.000000e+00 : f32
      %61 = vector.broadcast %cst_39 : f32 to vector<4x128xf32>
      %c0_40 = arith.constant 0 : index
      %c0_41 = arith.constant 0 : index
      %62 = vector.load %arg10[%c0_40, %c0_41] : memref<4x128xf32, #tpu.memory_space<vmem>>, vector<4x128xf32>
      tpu.vector_store %arg10[%c0_40, %c0_41], %61 {strides = array<i32>} : memref<4x128xf32, #tpu.memory_space<vmem>>, vector<4x128xf32>,
    } else {
    }
    %c0 = arith.constant 0 : index
    %c0_1 = arith.constant 0 : index
    %c0_2 = arith.constant 0 : index
    %3 = vector.load %arg2[%c0, %c0_1, %c0_2] : memref<1x4x128xf32, #tpu.memory_space<vmem>>, vector<1x4x128xf32>
    %4 = vector.shape_cast %3 : vector<1x4x128xf32> to vector<4x128xf32>
    %c0_3 = arith.constant 0 : index
    %c0_4 = arith.constant 0 : index
    %5 = vector.load %arg3[%c0_3, %c0_4] : memref<8x4xf32, #tpu.memory_space<vmem>>, vector<8x4xf32>
    %c0_5 = arith.constant 0 : index
    %c0_6 = arith.constant 0 : index
    %6 = vector.load %arg4[%c0_5, %c0_6] : memref<8x1xf32, #tpu.memory_space<vmem>>, vector<8x1xf32>
    %c0_7 = arith.constant 0 : index
    %c0_8 = arith.constant 0 : index
    %7 = vector.load %arg5[%c0_7, %c0_8] : memref<8x1xf32, #tpu.memory_space<vmem>>, vector<8x1xf32>
    %cst = arith.constant dense<0.000000e+00> : vector<8x128xf32>
    %8 = tpu.matmul %5, %4, %cst {dimension_numbers = #tpu.dot_dimension_numbers<[1], [0], [0], [1], [0, 0, 1, 1], [], []>} : vector<8x4xf32>, vector<4x128xf32>, vector<8x128xf32> -> vector<8x128xf32>
    %9 = vector.broadcast %6 : vector<8x1xf32> to vector<8x128xf32>
    %10 = arith.addf %8, %9 : vector<8x128xf32>
    %11 = math.tanh %10 : vector<8x128xf32>
    %12 = vector.broadcast %7 : vector<8x1xf32> to vector<8x128xf32>
    %13 = arith.mulf %12, %11 : vector<8x128xf32>
    %cst_9 = arith.constant dense<0.000000e+00> : vector<128xf32>
    %14 = vector.multi_reduction <add>, %13, %cst_9 [0] : vector<8x128xf32> to vector<128xf32>
    %15 = vector.shape_cast %14 : vector<128xf32> to vector<1x128xf32>
    %c128_i32 = arith.constant 128 : i32
    %16 = arith.muli %arg1, %c128_i32 : i32
    %17 = tpu.iota {dimensions = array<i32: 1>} : vector<1x128xi32>
    %18 = vector.broadcast %16 : i32 to vector<1x128xi32>
    %19 = arith.addi %18, %17 : vector<1x128xi32>
    %c16_i32 = arith.constant 16 : i32
    %20 = vector.broadcast %c16_i32 : i32 to vector<1x128xi32>
    %21 = arith.cmpi slt, %19, %20 : vector<1x128xi32>
    %cst_10 = arith.constant 0xFF800000 : f32
    %22 = vector.broadcast %cst_10 : f32 to vector<1x128xf32>
    %23 = arith.select %21, %15, %22 : vector<1x128xi1>, vector<1x128xf32>
    %c0_11 = arith.constant 0 : index
    %c0_12 = arith.constant 0 : index
    %24 = vector.load %arg7[%c0_11, %c0_12] : memref<1x1xf32, #tpu.memory_space<vmem>>, vector<1x1xf32>
    %cst_13 = arith.constant dense<0xFF800000> : vector<1xf32>
    %25 = vector.multi_reduction <maximumf>, %23, %cst_13 [1] : vector<1x128xf32> to vector<1xf32>
    %26 = vector.shape_cast %25 : vector<1xf32> to vector<1x1xf32>
    %27 = arith.maximumf %24, %26 : vector<1x1xf32>
    %28 = arith.subf %24, %27 : vector<1x1xf32>
    %29 = math.exp %28 : vector<1x1xf32>
    %30 = vector.broadcast %27 : vector<1x1xf32> to vector<1x128xf32>
    %31 = arith.subf %23, %30 : vector<1x128xf32>
    %32 = math.exp %31 : vector<1x128xf32>
    %33 = vector.broadcast %32 : vector<1x128xf32> to vector<4x128xf32>
    %34 = arith.mulf %4, %33 : vector<4x128xf32>
    %35 = arith.mulf %4, %34 : vector<4x128xf32>
    %c0_14 = arith.constant 0 : index
    %c0_15 = arith.constant 0 : index
    %36 = vector.load %arg8[%c0_14, %c0_15] : memref<1x128xf32, #tpu.memory_space<vmem>>, vector<1x128xf32>
    %37 = vector.broadcast %29 : vector<1x1xf32> to vector<1x128xf32>
    %38 = arith.mulf %37, %36 : vector<1x128xf32>
    %39 = arith.addf %38, %32 : vector<1x128xf32>
    %c0_16 = arith.constant 0 : index
    %c0_17 = arith.constant 0 : index
    %40 = vector.load %arg8[%c0_16, %c0_17] : memref<1x128xf32, #tpu.memory_space<vmem>>, vector<1x128xf32>
    tpu.vector_store %arg8[%c0_16, %c0_17], %39 {strides = array<i32>} : memref<1x128xf32, #tpu.memory_space<vmem>>, vector<1x128xf32>,
    %c0_18 = arith.constant 0 : index
    %c0_19 = arith.constant 0 : index
    %41 = vector.load %arg9[%c0_18, %c0_19] : memref<4x128xf32, #tpu.memory_space<vmem>>, vector<4x128xf32>
    %42 = vector.broadcast %29 : vector<1x1xf32> to vector<4x128xf32>
    %43 = arith.mulf %42, %41 : vector<4x128xf32>
    %44 = arith.addf %43, %34 : vector<4x128xf32>
    %c0_20 = arith.constant 0 : index
    %c0_21 = arith.constant 0 : index
    %45 = vector.load %arg9[%c0_20, %c0_21] : memref<4x128xf32, #tpu.memory_space<vmem>>, vector<4x128xf32>
    tpu.vector_store %arg9[%c0_20, %c0_21], %44 {strides = array<i32>} : memref<4x128xf32, #tpu.memory_space<vmem>>, vector<4x128xf32>,
    %c0_22 = arith.constant 0 : index
    %c0_23 = arith.constant 0 : index
    %46 = vector.load %arg10[%c0_22, %c0_23] : memref<4x128xf32, #tpu.memory_space<vmem>>, vector<4x128xf32>
    %47 = vector.broadcast %29 : vector<1x1xf32> to vector<4x128xf32>
    %48 = arith.mulf %47, %46 : vector<4x128xf32>
    %49 = arith.addf %48, %35 : vector<4x128xf32>
    %c0_24 = arith.constant 0 : index
    %c0_25 = arith.constant 0 : index
    %50 = vector.load %arg10[%c0_24, %c0_25] : memref<4x128xf32, #tpu.memory_space<vmem>>, vector<4x128xf32>
    tpu.vector_store %arg10[%c0_24, %c0_25], %49 {strides = array<i32>} : memref<4x128xf32, #tpu.memory_space<vmem>>, vector<4x128xf32>,
    %c0_26 = arith.constant 0 : index
    %c0_27 = arith.constant 0 : index
    %51 = vector.load %arg7[%c0_26, %c0_27] : memref<1x1xf32, #tpu.memory_space<vmem>>, vector<1x1xf32>
    tpu.vector_store %arg7[%c0_26, %c0_27], %27 {strides = array<i32>} : memref<1x1xf32, #tpu.memory_space<vmem>>, vector<1x1xf32>,
    %c0_i32_28 = arith.constant 0 : i32
    %52 = arith.cmpi eq, %arg1, %c0_i32_28 : i32
    %53 = arith.extui %52 : i1 to i32
    %c0_i32_29 = arith.constant 0 : i32
    %54 = arith.cmpi ne, %53, %c0_i32_29 : i32
    scf.if %54 {
      %c0_30 = arith.constant 0 : index
      %c0_31 = arith.constant 0 : index
      %55 = vector.load %arg8[%c0_30, %c0_31] : memref<1x128xf32, #tpu.memory_space<vmem>>, vector<1x128xf32>
      %cst_32 = arith.constant dense<0.000000e+00> : vector<1xf32>
      %56 = vector.multi_reduction <add>, %55, %cst_32 [1] : vector<1x128xf32> to vector<1xf32>
      %57 = vector.shape_cast %56 : vector<1xf32> to vector<1x1xf32>
      %c0_33 = arith.constant 0 : index
      %c0_34 = arith.constant 0 : index
      %58 = vector.load %arg9[%c0_33, %c0_34] : memref<4x128xf32, #tpu.memory_space<vmem>>, vector<4x128xf32>
      %cst_35 = arith.constant dense<0.000000e+00> : vector<4xf32>
      %59 = vector.multi_reduction <add>, %58, %cst_35 [1] : vector<4x128xf32> to vector<4xf32>
      %60 = vector.shape_cast %59 : vector<4xf32> to vector<4x1xf32>
      %c0_36 = arith.constant 0 : index
      %c0_37 = arith.constant 0 : index
      %61 = vector.load %arg10[%c0_36, %c0_37] : memref<4x128xf32, #tpu.memory_space<vmem>>, vector<4x128xf32>
      %cst_38 = arith.constant dense<0.000000e+00> : vector<4xf32>
      %62 = vector.multi_reduction <add>, %61, %cst_38 [1] : vector<4x128xf32> to vector<4xf32>
      %63 = vector.shape_cast %62 : vector<4xf32> to vector<4x1xf32>
      %cst_39 = arith.constant 1.000000e+00 : f32
      %64 = vector.broadcast %cst_39 : f32 to vector<1x1xf32>
      %65 = arith.divf %64, %57 : vector<1x1xf32>
      %66 = vector.broadcast %65 : vector<1x1xf32> to vector<4x1xf32>
      %67 = arith.mulf %60, %66 : vector<4x1xf32>
      %68 = vector.broadcast %65 : vector<1x1xf32> to vector<4x1xf32>
      %69 = arith.mulf %63, %68 : vector<4x1xf32>
      %70 = arith.mulf %67, %67 : vector<4x1xf32>
      %71 = arith.subf %69, %70 : vector<4x1xf32>
      %cst_40 = arith.constant 1.000000e-07 : f32
      %72 = vector.broadcast %cst_40 : f32 to vector<4x1xf32>
      %73 = arith.maximumf %71, %72 : vector<4x1xf32>
      %74 = math.sqrt %73 : vector<4x1xf32>
      %75 = tpu.concatenate %67, %74 in 0 : vector<4x1xf32>, vector<4x1xf32> -> vector<8x1xf32>
      %76 = tpu.transpose %75, [1, 0] : vector<8x1xf32> -> vector<1x8xf32>
      %77 = vector.shape_cast %76 : vector<1x8xf32> to vector<1x1x8xf32>
      %c0_41 = arith.constant 0 : index
      %c0_42 = arith.constant 0 : index
      %c0_43 = arith.constant 0 : index
      %78 = vector.load %arg6[%c0_41, %c0_42, %c0_43] : memref<1x1x8xf32, #tpu.memory_space<vmem>>, vector<1x1x8xf32>
      tpu.vector_store %arg6[%c0_41, %c0_42, %c0_43], %77 {strides = array<i32>} : memref<1x1x8xf32, #tpu.memory_space<vmem>>, vector<1x1x8xf32>,
    } else {
    }
    return
  }
  func.func @transform_0(%arg0: i32, %arg1: i32) -> (i32, i32, i32) {
    %c0_i32 = arith.constant 0 : i32
    %c0_i32_0 = arith.constant 0 : i32
    return %arg0, %c0_i32, %arg1 : i32, i32, i32
  }
  func.func @transform_1(%arg0: i32, %arg1: i32) -> (i32, i32) {
    %c0_i32 = arith.constant 0 : i32
    %c0_i32_0 = arith.constant 0 : i32
    %c0_i32_1 = arith.constant 0 : i32
    return %c0_i32, %c0_i32_0 : i32, i32
  }
  func.func @transform_2(%arg0: i32, %arg1: i32) -> (i32, i32) {
    %c0_i32 = arith.constant 0 : i32
    %c0_i32_0 = arith.constant 0 : i32
    %c0_i32_1 = arith.constant 0 : i32
    return %c0_i32, %c0_i32_0 : i32, i32
  }
  func.func @transform_3(%arg0: i32, %arg1: i32) -> (i32, i32) {
    %c0_i32 = arith.constant 0 : i32
    %c0_i32_0 = arith.constant 0 : i32
    %c0_i32_1 = arith.constant 0 : i32
    return %c0_i32, %c0_i32_0 : i32, i32
  }
  func.func @transform_4(%arg0: i32, %arg1: i32) -> (i32, i32, i32) {
    %c0_i32 = arith.constant 0 : i32
    %c0_i32_0 = arith.constant 0 : i32
    %c0_i32_1 = arith.constant 0 : i32
    return %arg0, %c0_i32, %c0_i32_0 : i32, i32, i32
  }
}

module attributes {stable_mosaic.version = 11 : i64} {
  func.func @att_stats_pool_kernel(%arg0: i32, %arg1: i32, %arg2: memref<1x4x128xf32, #tpu.memory_space<vmem>>, %arg3: memref<8x4xf32, #tpu.memory_space<vmem>>, %arg4: memref<8x1xf32, #tpu.memory_space<vmem>>, %arg5: memref<8x1xf32, #tpu.memory_space<vmem>>, %arg6: memref<1x1x8xf32, #tpu.memory_space<vmem>>, %arg7: memref<1x1xf32, #tpu.memory_space<vmem>>, %arg8: memref<1x128xf32, #tpu.memory_space<vmem>>, %arg9: memref<4x128xf32, #tpu.memory_space<vmem>>, %arg10: memref<4x128xf32, #tpu.memory_space<vmem>>) attributes {dimension_semantics = [#tpu.dimension_semantics<parallel>, #tpu.dimension_semantics<arbitrary>], iteration_bounds = array<i64: 2, 1>, scalar_prefetch = 0 : i64, scratch_operands = 4 : i64, tpu.core_type = #tpu.core_type<tc>, window_params = [{transform_indices = @transform_0, window_bounds = array<i64: 1, 4, 128>}, {pipeline_mode = #tpu.pipeline_mode<synchronous>, transform_indices = @transform_1, window_bounds = array<i64: 8, 4>}, {pipeline_mode = #tpu.pipeline_mode<synchronous>, transform_indices = @transform_2, window_bounds = array<i64: 8, 1>}, {pipeline_mode = #tpu.pipeline_mode<synchronous>, transform_indices = @transform_3, window_bounds = array<i64: 8, 1>}, {transform_indices = @transform_4, window_bounds = array<i64: 1, 1, 8>}]} {
    %c0_i32 = arith.constant 0 : i32
    %0 = arith.cmpi eq, %arg1, %c0_i32 : i32
    %1 = arith.extui %0 : i1 to i32
    %c0_i32_0 = arith.constant 0 : i32
    %2 = arith.cmpi ne, %1, %c0_i32_0 : i32
    scf.if %2 {
      %cst_30 = arith.constant 0xFF800000 : f32
      %55 = vector.broadcast %cst_30 : f32 to vector<1x1xf32>
      %c0_31 = arith.constant 0 : index
      %c0_32 = arith.constant 0 : index
      %56 = vector.load %arg7[%c0_31, %c0_32] : memref<1x1xf32, #tpu.memory_space<vmem>>, vector<1x1xf32>
      tpu.vector_store %arg7[%c0_31, %c0_32], %55 {strides = array<i32>} : memref<1x1xf32, #tpu.memory_space<vmem>>, vector<1x1xf32>,
      %cst_33 = arith.constant 0.000000e+00 : f32
      %57 = vector.broadcast %cst_33 : f32 to vector<1x128xf32>
      %c0_34 = arith.constant 0 : index
      %c0_35 = arith.constant 0 : index
      %58 = vector.load %arg8[%c0_34, %c0_35] : memref<1x128xf32, #tpu.memory_space<vmem>>, vector<1x128xf32>
      tpu.vector_store %arg8[%c0_34, %c0_35], %57 {strides = array<i32>} : memref<1x128xf32, #tpu.memory_space<vmem>>, vector<1x128xf32>,
      %cst_36 = arith.constant 0.000000e+00 : f32
      %59 = vector.broadcast %cst_36 : f32 to vector<4x128xf32>
      %c0_37 = arith.constant 0 : index
      %c0_38 = arith.constant 0 : index
      %60 = vector.load %arg9[%c0_37, %c0_38] : memref<4x128xf32, #tpu.memory_space<vmem>>, vector<4x128xf32>
      tpu.vector_store %arg9[%c0_37, %c0_38], %59 {strides = array<i32>} : memref<4x128xf32, #tpu.memory_space<vmem>>, vector<4x128xf32>,
      %cst_39 = arith.constant 0.000000e+00 : f32
      %61 = vector.broadcast %cst_39 : f32 to vector<4x128xf32>
      %c0_40 = arith.constant 0 : index
      %c0_41 = arith.constant 0 : index
      %62 = vector.load %arg10[%c0_40, %c0_41] : memref<4x128xf32, #tpu.memory_space<vmem>>, vector<4x128xf32>
      tpu.vector_store %arg10[%c0_40, %c0_41], %61 {strides = array<i32>} : memref<4x128xf32, #tpu.memory_space<vmem>>, vector<4x128xf32>,
    } else {
    }
    %c0 = arith.constant 0 : index
    %c0_1 = arith.constant 0 : index
    %c0_2 = arith.constant 0 : index
    %3 = vector.load %arg2[%c0, %c0_1, %c0_2] : memref<1x4x128xf32, #tpu.memory_space<vmem>>, vector<1x4x128xf32>
    %4 = vector.shape_cast %3 : vector<1x4x128xf32> to vector<4x128xf32>
    %c0_3 = arith.constant 0 : index
    %c0_4 = arith.constant 0 : index
    %5 = vector.load %arg3[%c0_3, %c0_4] : memref<8x4xf32, #tpu.memory_space<vmem>>, vector<8x4xf32>
    %c0_5 = arith.constant 0 : index
    %c0_6 = arith.constant 0 : index
    %6 = vector.load %arg4[%c0_5, %c0_6] : memref<8x1xf32, #tpu.memory_space<vmem>>, vector<8x1xf32>
    %c0_7 = arith.constant 0 : index
    %c0_8 = arith.constant 0 : index
    %7 = vector.load %arg5[%c0_7, %c0_8] : memref<8x1xf32, #tpu.memory_space<vmem>>, vector<8x1xf32>
    %cst = arith.constant dense<0.000000e+00> : vector<8x128xf32>
    %8 = tpu.matmul %5, %4, %cst {dimension_numbers = #tpu.dot_dimension_numbers<[1], [0], [0], [1], [0, 0, 1, 1], [], []>} : vector<8x4xf32>, vector<4x128xf32>, vector<8x128xf32> -> vector<8x128xf32>
    %9 = vector.broadcast %6 : vector<8x1xf32> to vector<8x128xf32>
    %10 = arith.addf %8, %9 : vector<8x128xf32>
    %11 = math.tanh %10 : vector<8x128xf32>
    %12 = vector.broadcast %7 : vector<8x1xf32> to vector<8x128xf32>
    %13 = arith.mulf %12, %11 : vector<8x128xf32>
    %cst_9 = arith.constant dense<0.000000e+00> : vector<128xf32>
    %14 = vector.multi_reduction <add>, %13, %cst_9 [0] : vector<8x128xf32> to vector<128xf32>
    %15 = vector.shape_cast %14 : vector<128xf32> to vector<1x128xf32>
    %c128_i32 = arith.constant 128 : i32
    %16 = arith.muli %arg1, %c128_i32 : i32
    %17 = tpu.iota {dimensions = array<i32: 1>} : vector<1x128xi32>
    %18 = vector.broadcast %16 : i32 to vector<1x128xi32>
    %19 = arith.addi %18, %17 : vector<1x128xi32>
    %c16_i32 = arith.constant 16 : i32
    %20 = vector.broadcast %c16_i32 : i32 to vector<1x128xi32>
    %21 = arith.cmpi slt, %19, %20 : vector<1x128xi32>
    %cst_10 = arith.constant 0xFF800000 : f32
    %22 = vector.broadcast %cst_10 : f32 to vector<1x128xf32>
    %23 = arith.select %21, %15, %22 : vector<1x128xi1>, vector<1x128xf32>
    %c0_11 = arith.constant 0 : index
    %c0_12 = arith.constant 0 : index
    %24 = vector.load %arg7[%c0_11, %c0_12] : memref<1x1xf32, #tpu.memory_space<vmem>>, vector<1x1xf32>
    %cst_13 = arith.constant dense<0xFF800000> : vector<1xf32>
    %25 = vector.multi_reduction <maximumf>, %23, %cst_13 [1] : vector<1x128xf32> to vector<1xf32>
    %26 = vector.shape_cast %25 : vector<1xf32> to vector<1x1xf32>
    %27 = arith.maximumf %24, %26 : vector<1x1xf32>
    %28 = arith.subf %24, %27 : vector<1x1xf32>
    %29 = math.exp %28 : vector<1x1xf32>
    %30 = vector.broadcast %27 : vector<1x1xf32> to vector<1x128xf32>
    %31 = arith.subf %23, %30 : vector<1x128xf32>
    %32 = math.exp %31 : vector<1x128xf32>
    %33 = vector.broadcast %32 : vector<1x128xf32> to vector<4x128xf32>
    %34 = arith.mulf %4, %33 : vector<4x128xf32>
    %35 = arith.mulf %4, %34 : vector<4x128xf32>
    %c0_14 = arith.constant 0 : index
    %c0_15 = arith.constant 0 : index
    %36 = vector.load %arg8[%c0_14, %c0_15] : memref<1x128xf32, #tpu.memory_space<vmem>>, vector<1x128xf32>
    %37 = vector.broadcast %29 : vector<1x1xf32> to vector<1x128xf32>
    %38 = arith.mulf %37, %36 : vector<1x128xf32>
    %39 = arith.addf %38, %32 : vector<1x128xf32>
    %c0_16 = arith.constant 0 : index
    %c0_17 = arith.constant 0 : index
    %40 = vector.load %arg8[%c0_16, %c0_17] : memref<1x128xf32, #tpu.memory_space<vmem>>, vector<1x128xf32>
    tpu.vector_store %arg8[%c0_16, %c0_17], %39 {strides = array<i32>} : memref<1x128xf32, #tpu.memory_space<vmem>>, vector<1x128xf32>,
    %c0_18 = arith.constant 0 : index
    %c0_19 = arith.constant 0 : index
    %41 = vector.load %arg9[%c0_18, %c0_19] : memref<4x128xf32, #tpu.memory_space<vmem>>, vector<4x128xf32>
    %42 = vector.broadcast %29 : vector<1x1xf32> to vector<4x128xf32>
    %43 = arith.mulf %42, %41 : vector<4x128xf32>
    %44 = arith.addf %43, %34 : vector<4x128xf32>
    %c0_20 = arith.constant 0 : index
    %c0_21 = arith.constant 0 : index
    %45 = vector.load %arg9[%c0_20, %c0_21] : memref<4x128xf32, #tpu.memory_space<vmem>>, vector<4x128xf32>
    tpu.vector_store %arg9[%c0_20, %c0_21], %44 {strides = array<i32>} : memref<4x128xf32, #tpu.memory_space<vmem>>, vector<4x128xf32>,
    %c0_22 = arith.constant 0 : index
    %c0_23 = arith.constant 0 : index
    %46 = vector.load %arg10[%c0_22, %c0_23] : memref<4x128xf32, #tpu.memory_space<vmem>>, vector<4x128xf32>
    %47 = vector.broadcast %29 : vector<1x1xf32> to vector<4x128xf32>
    %48 = arith.mulf %47, %46 : vector<4x128xf32>
    %49 = arith.addf %48, %35 : vector<4x128xf32>
    %c0_24 = arith.constant 0 : index
    %c0_25 = arith.constant 0 : index
    %50 = vector.load %arg10[%c0_24, %c0_25] : memref<4x128xf32, #tpu.memory_space<vmem>>, vector<4x128xf32>
    tpu.vector_store %arg10[%c0_24, %c0_25], %49 {strides = array<i32>} : memref<4x128xf32, #tpu.memory_space<vmem>>, vector<4x128xf32>,
    %c0_26 = arith.constant 0 : index
    %c0_27 = arith.constant 0 : index
    %51 = vector.load %arg7[%c0_26, %c0_27] : memref<1x1xf32, #tpu.memory_space<vmem>>, vector<1x1xf32>
    tpu.vector_store %arg7[%c0_26, %c0_27], %27 {strides = array<i32>} : memref<1x1xf32, #tpu.memory_space<vmem>>, vector<1x1xf32>,
    %c0_i32_28 = arith.constant 0 : i32
    %52 = arith.cmpi eq, %arg1, %c0_i32_28 : i32
    %53 = arith.extui %52 : i1 to i32
    %c0_i32_29 = arith.constant 0 : i32
    %54 = arith.cmpi ne, %53, %c0_i32_29 : i32
    scf.if %54 {
      %c0_30 = arith.constant 0 : index
      %c0_31 = arith.constant 0 : index
      %55 = vector.load %arg8[%c0_30, %c0_31] : memref<1x128xf32, #tpu.memory_space<vmem>>, vector<1x128xf32>
      %cst_32 = arith.constant dense<0.000000e+00> : vector<1xf32>
      %56 = vector.multi_reduction <add>, %55, %cst_32 [1] : vector<1x128xf32> to vector<1xf32>
      %57 = vector.shape_cast %56 : vector<1xf32> to vector<1x1xf32>
      %c0_33 = arith.constant 0 : index
      %c0_34 = arith.constant 0 : index
      %58 = vector.load %arg9[%c0_33, %c0_34] : memref<4x128xf32, #tpu.memory_space<vmem>>, vector<4x128xf32>
      %cst_35 = arith.constant dense<0.000000e+00> : vector<4xf32>
      %59 = vector.multi_reduction <add>, %58, %cst_35 [1] : vector<4x128xf32> to vector<4xf32>
      %60 = vector.shape_cast %59 : vector<4xf32> to vector<4x1xf32>
      %c0_36 = arith.constant 0 : index
      %c0_37 = arith.constant 0 : index
      %61 = vector.load %arg10[%c0_36, %c0_37] : memref<4x128xf32, #tpu.memory_space<vmem>>, vector<4x128xf32>
      %cst_38 = arith.constant dense<0.000000e+00> : vector<4xf32>
      %62 = vector.multi_reduction <add>, %61, %cst_38 [1] : vector<4x128xf32> to vector<4xf32>
      %63 = vector.shape_cast %62 : vector<4xf32> to vector<4x1xf32>
      %cst_39 = arith.constant 1.000000e+00 : f32
      %64 = vector.broadcast %cst_39 : f32 to vector<1x1xf32>
      %65 = arith.divf %64, %57 : vector<1x1xf32>
      %66 = vector.broadcast %65 : vector<1x1xf32> to vector<4x1xf32>
      %67 = arith.mulf %60, %66 : vector<4x1xf32>
      %68 = vector.broadcast %65 : vector<1x1xf32> to vector<4x1xf32>
      %69 = arith.mulf %63, %68 : vector<4x1xf32>
      %70 = arith.mulf %67, %67 : vector<4x1xf32>
      %71 = arith.subf %69, %70 : vector<4x1xf32>
      %cst_40 = arith.constant 1.000000e-07 : f32
      %72 = vector.broadcast %cst_40 : f32 to vector<4x1xf32>
      %73 = arith.maximumf %71, %72 : vector<4x1xf32>
      %74 = math.sqrt %73 : vector<4x1xf32>
      %75 = tpu.concatenate %67, %74 in 0 : vector<4x1xf32>, vector<4x1xf32> -> vector<8x1xf32>
      %76 = tpu.transpose %75, [1, 0] : vector<8x1xf32> -> vector<1x8xf32>
      %77 = vector.shape_cast %76 : vector<1x8xf32> to vector<1x1x8xf32>
      %c0_41 = arith.constant 0 : index
      %c0_42 = arith.constant 0 : index
      %c0_43 = arith.constant 0 : index
      %78 = vector.load %arg6[%c0_41, %c0_42, %c0_43] : memref<1x1x8xf32, #tpu.memory_space<vmem>>, vector<1x1x8xf32>
      tpu.vector_store %arg6[%c0_41, %c0_42, %c0_43], %77 {strides = array<i32>} : memref<1x1x8xf32, #tpu.memory_space<vmem>>, vector<1x1x8xf32>,
    } else {
    }
    return
  }
  func.func @transform_0(%arg0: i32, %arg1: i32) -> (i32, i32, i32) {
    %c0_i32 = arith.constant 0 : i32
    %c0_i32_0 = arith.constant 0 : i32
    return %arg0, %c0_i32, %arg1 : i32, i32, i32
  }
  func.func @transform_1(%arg0: i32, %arg1: i32) -> (i32, i32) {
    %c0_i32 = arith.constant 0 : i32
    %c0_i32_0 = arith.constant 0 : i32
    %c0_i32_1 = arith.constant 0 : i32
    return %c0_i32, %c0_i32_0 : i32, i32
  }
  func.func @transform_2(%arg0: i32, %arg1: i32) -> (i32, i32) {
    %c0_i32 = arith.constant 0 : i32
    %c0_i32_0 = arith.constant 0 : i32
    %c0_i32_1 = arith.constant 0 : i32
    return %c0_i32, %c0_i32_0 : i32, i32
  }
  func.func @transform_3(%arg0: i32, %arg1: i32) -> (i32, i32) {
    %c0_i32 = arith.constant 0 : i32
    %c0_i32_0 = arith.constant 0 : i32
    %c0_i32_1 = arith.constant 0 : i32
    return %c0_i32, %c0_i32_0 : i32, i32
  }
  func.func @transform_4(%arg0: i32, %arg1: i32) -> (i32, i32, i32) {
    %c0_i32 = arith.constant 0 : i32
    %c0_i32_0 = arith.constant 0 : i32
    %c0_i32_1 = arith.constant 0 : i32
    return %arg0, %c0_i32, %c0_i32_0 : i32, i32, i32
  }
}

</mosaic_0001>

<bundles_post_ra>
// kernel: tpu_custom_call.1
= control target key start
LH: loop header
LB: loop body
LE: loop exit
PB: predicated region body
PF: predicated region fallthrough
CT: control target
= control target key end

     0   :  { %9 = vsyncpa [#allocation7], 0  ;;  %s860_s0 = inlined_call_operand.vmem [shape: f32[2,4,128], index: 0, kind: input, shape index: {}]   ;;  %s861_s1 = inlined_call_operand.vmem [shape: f32[8,4], index: 1, kind: input, shape index: {}]   ;;  %s862_s2 = inlined_call_operand.vmem [shape: f32[8,1], index: 2, kind: input, shape index: {}]   ;;  %s863_s3 = inlined_call_operand.vmem [shape: f32[8,1], index: 3, kind: input, shape index: {}]   ;;  %s864_s4 = inlined_call_operand.hbm [shape: f32[2,1,8], index: 4, kind: output, shape index: {}]  }
   0x1   :  { %11 = vsyncpa [#allocation7 + $0x1], 0  ;;  %s733_s15 = smov 0   ;;  %s735_s16 = smov 0  }
   0x2   :  { %s737_s17 = smov 0   ;;  %s739_s18 = smov 0  }
   0x3   :  { %s741_s19 = smov 0   ;;  %s743_s20 = smov 0  }
   0x4 LB: > { %s534_s21 = sadd.s32 4294967295, %s701_s20   ;;  %s535_s22 = sadd.s32 4294967294, %s701_s20   ;;  %s701_s20 = sphi %s743_s20, %s17_s20   ;;  %s697_s19 = sphi %s741_s19, %s871_s19   ;;  %s693_s18 = sphi %s739_s18, %s870_s18   ;;  %s689_s17 = sphi %s737_s17, %s869_s17   ;;  %s685_s16 = sphi %s735_s16, %s868_s16   ;;  %s681_s15 = sphi %s733_s15, %s867_s15  }
   0x5   : > { %s29_s23 = sadd.s32 1, %s697_s19  ;;  %s127_s24 = sadd.s32 1, %s689_s17 }
   0x6   : > { %p31_p0 = scmp.ge.s32.totalorder %s29_s23, 2  ;;  %p137_p1 = scmp.ne.s32.totalorder %s689_s17, %s685_s16 }
   0x7   : > { %p138_p2 = scmp.eq.s32.totalorder %s534_s21, 1  ;;  %p143_p3 = scmp.ne.s32.totalorder %s685_s16, %s681_s15 }
   0x8   : > { %s873_s23 = smov (%p31_p0, %s29_s23), 0  ;;  %p144_p5 = scmp.eq.s32.totalorder %s535_s22, 1 }
   0x9   : > { %p773_p4 = por %p138_p2, %p137_p1  ;;  %s124_s26 = ssub.s32 %s697_s19, %s873_s23 }
   0xa   : > { %p538_p6 = scmp.ge.s32.totalorder %s701_s20, 1  ;;  %p125_p7 = scmp.eq.s32.totalorder %s124_s26, 0 }
   0xb   : > { %p780_p8 = por %p144_p5, %p143_p3  ;;  %p181_p9 = scmp.lt.s32.totalorder %s701_s20, 3 }
   0xc   : > { %s786_s28 = scalar_select %p125_p7, %s689_s17, %s127_s24  }
   0xd   : > { %p182_p10 = pnand %p538_p6, %p181_p9 }
   0xe   : > { %p208_p11 = scmp.lt.s32.totalorder (!%p182_p10), %s693_s18, 1  ;;  %v703_v0 = vmov (!%p182_p10), 0.0   ;;  %vm704_vm0 = vmmov (!%p182_p10), 0   ;;  %v226_v1 = vld [vmem:[%s862_s2] sm:$0xff] (!%p182_p10)  ;;  %v705_v2 = vmov (!%p182_p10), 0   ;;  %vm237_vm1 = vcmask (!%p182_p10), 1043456  }
   0xf   : > { %185 = sbr.rel (%p182_p10) target bundleno = 894 (0x37e), region = 36  ;;  %547 = vmatprep.subr.mxu0 (!%p182_p10), %v703_v0  ;;  %221 = vst [vmem:[#allocation3] sm:$0x1] (!%p182_p10), %v703_v0  ;;  %222 = vst [vmem:[#allocation4] sm:$0xf] (!%p182_p10), %v703_v0  ;;  %549 = vmatprep.mubr.msk.f32.mxu0 (!%p182_p10), %vm704_vm0, %v703_v0  ;;  %v227_v3 = vld [vmem:[%s863_s3] sm:$0xff] (!%p182_p10)  ;;  %v325_v15 = vlaneseq (!%p182_p10) }
  0x10   : > { %223 = vst [vmem:[#allocation5] sm:$0xf] (!%p182_p10), %v703_v0  ;;  %611 = vset.pattern.permute.xlu0 (!%p182_p10), %v705_v2  ;;  %612 = vset.pattern.permute.xlu1 (!%p182_p10), %v705_v2  ;;  %v225_v4 = vld [vmem:[%s861_s1] sm:$0xff] (!%p182_p10)  ;;  %vm233_vm2 = vcmask (!%p182_p10), 31744   ;;  %vm219_vm3 = vcmask (!%p182_p10), 0   ;;  %v706_v6 = vmov (!%p182_p10), -inf  }
  0x11   : > { %230 = vperm.xlu0 (!%p182_p10), %611, %v226_v1   ;;  %220 = vst.msk [vmem:[#allocation2] sm:$0x1] (!%p182_p10), %vm219_vm3, %v706_v6  ;;  %v326_v18 = vand.u32 (!%p182_p10), 127, %v325_v15  ;;  %v344_v28 = vshrl.u32 (!%p182_p10), %v325_v15, 7  ;;  %vm387_vm5 = vcmask (!%p182_p10), 1040384   ;;  %s206_s14 = sand.u32 (!%p182_p10), 1, %s685_s16  }
  0x12   : > { %s542_s21 = sshll.u32 (!%p182_p10), %s693_s18, 4  ;;  %s207_s22 = scalar_lea.vmem (!%p182_p10), [#allocation6], %s206_s14  ;;  %vm453_vm8 = vcmask (!%p182_p10), 57344  }
  0x13   : > { %vm329_vm4 = vcmp.lt.s32.totalorder (!%p182_p10), %v326_v18, 16  ;;  %v345_v29 = vsub.s32 (!%p182_p10), 0, %v344_v28  ;;  %s468_s24 = sshll.u32 (!%p182_p10), %s207_s22, 4  ;;  %s813_s30 = scalar_lea.hbm (!%p182_p10), %s864_s4, %s542_s21  ;;  %s815_s24 = int_to_ptr.vmem [resolvable:$true] %s468_s24 }
  0x15   : > { %314 = vperm.xlu0 (!%p182_p10), %611, %v227_v3  }
  0x16   : > { %s209_s5 = scalar_select %p208_p11, %s693_s18, 1  ;;  %v352_v36 = vld [vmem:[#allocation3] sm:$0x1]  ;;  %v365_v40 = vld [vmem:[#allocation4] sm:$0xf] }
  0x17   : > { %v377_v41 = vld [vmem:[#allocation5] sm:$0xf]  ;;  %s707_s18 = smov [#allocation6]  }
  0x18   : > { %s539_s6 = sshll.u32 %s209_s5, 2  ;;  %v331_v23 = vld [vmem:[#allocation2] sm:$0x1]  ;;  %s456_s5 = scalar_lea.sflag [#allocation7], %s206_s14 }
  0x19   : > { %s214_s11 = scalar_lea.vmem %s860_s0, %s539_s6  ;;  %s623_s6 = scalar_lea.vmem %s815_s24, 16 }
  0x1a   : > { %v224_v5 = vld [vmem:[%s214_s11] sm:$0xf]  ;;  %p624_p12 = scmp.ne.s32.totalorder %s815_s24, %s623_s6  ;;  %s627_s7 = sshll.u32 %s707_s18, 4  ;;  %s628_s7 = int_to_ptr.vmem [resolvable:$false] %s627_s7 }
  0x1b   : > { %548 = vmatpush3.msk.msra.mxu0 %vm237_vm1, %v224_v5  ;;  %s629_s8 = scalar_lea.vmem %s628_s7, 32  ;;  %p630_p1 = scmp.lt.s32.totalorder %s815_s24, %s628_s7 }
  0x1c   : > { %550 = vmatmul.mubr.msk.f32.vlgmr.msra.gmra.mrb[0].mxu0 %vm233_vm2, %v225_v4  ;;  %p625_p13 = pnand %p624_p12, %p773_p4  ;;  %p631_p2 = scmp.lt.s32.totalorder %s629_s8, %s623_s6 }
  0x1e   : > { %p626_p0 = pneg %p625_p13  ;;  %p632_p3 = por %p631_p2, %p630_p1 }
  0x20   : > { %p633_p5 = pnand %p632_p3, %p626_p0 }
  0x90   : > { %v231_v7 = vpop.permute.xlu0 %230 }
  0x94   : > { %v315_v12 = vpop.permute.xlu0 %314 }
  0xef   : > { %v307_v8 = vpop.f32.mrb[0].mxu0 }
  0xf0   : > { %v308_v9 = vadd.f32 %v307_v8, %v231_v7  ;;  %v551_v10 = vpop.f32.mrb[1].mxu0 }
  0xf2   : > { %613 = vtanh.f32 %v308_v9 }
  0xfc   : > { %v614_v11 = vpop.eup %613 }
  0xfd   : > { %v317_v13 = vmul.f32 %v614_v11, %v315_v12 }
  0xff   : > { %v318_v14 = vrot.slane %v317_v13, 4 }
 0x101   : > { %v319_v16 = vadd.f32 %v318_v14, %v317_v13 }
 0x103   : > { %v320_v17 = vrot.slane %v319_v16, 2 }
 0x105   : > { %v321_v19 = vadd.f32 %v320_v17, %v319_v16 }
 0x107   : > { %v322_v20 = vrot.slane %v321_v19, 1 }
 0x109   : > { %v323_v21 = vadd.f32 %v322_v20, %v321_v19 }
 0x10b   : > { %v330_v22 = vsel %vm329_vm4, %v323_v21, -inf }
 0x10c   : > { %332 = vmax.xlane.f32.xlu1 %v330_v22 }
 0x199   : > { %v333_v24 = vpop.xlane.xlu1 %332 }
 0x19a   : > { %v334_v25 = vmax.f32 %v331_v23, %v333_v24 }
 0x19c   : > { %v335_v26 = vsub.f32 %v331_v23, %v334_v25  ;;  %382 = vst.msk [vmem:[#allocation2] sm:$0x1] %vm219_vm3, %v334_v25  ;;  %340 = vperm.xlu1 %612, %v334_v25  }
 0x19e   : > { %v336_v27 = vmul.f32 1.442695, %v335_v26 }
 0x1a0   : > { %615 = vpow2.f32 %v336_v27 }
 0x1aa   : > { %v616_v30 = vpop.eup %615 }
 0x1ab   : > { %355 = vperm.xlu0 %611, %v616_v30   ;;  %v369_v31 = vrot.slane %v616_v30, %v345_v29 }
 0x1af   : > { %371 = vperm.xlu0 %611, %v369_v31  }
 0x21b   : > { %v341_v32 = vpop.permute.xlu1 %340 }
 0x21c   : > { %v346_v33 = vrot.slane %v341_v32, %v345_v29 }
 0x21e   : > { %v347_v34 = vsub.f32 %v330_v22, %v346_v33 }
 0x220   : > { %v348_v35 = vmul.f32 1.442695, %v347_v34 }
 0x222   : > { %617 = vpow2.f32 %v348_v35 }
 0x22a   : > { %v356_v37 = vpop.permute.xlu0 %355 }
 0x22b   : > { %v361_v38 = vrot.slane %v356_v37, %v345_v29 }
 0x22c   : > { %v618_v39 = vpop.eup %617 }
 0x22d   : > { %v362_v42 = vmul.f32 %v361_v38, %v352_v36  ;;  %v350_v43 = vmul.f32 %v618_v39, %v224_v5 }
 0x22e   : > { %v372_v44 = vpop.permute.xlu0 %371 }
 0x22f   : > { %v363_v45 = vadd.f32 %v618_v39, %v362_v42  ;;  %v351_v46 = vmul.f32 %v350_v43, %v224_v5  ;;  %v374_v47 = vmul.f32 %v372_v44, %v365_v40  ;;  %v378_v48 = vmul.f32 %v377_v41, %v372_v44 }
 0x231   : > { %364 = vst [vmem:[#allocation3] sm:$0x1] %v363_v45  ;;  %v375_v49 = vadd.f32 %v374_v47, %v350_v43  ;;  %v379_v50 = vadd.f32 %v378_v48, %v351_v46 }
 0x233   : > { %376 = vst [vmem:[#allocation4] sm:$0xf] %v375_v49  ;;  %380 = vst [vmem:[#allocation5] sm:$0xf] %v379_v50 }
 0x238   : > { %v386_v51 = vld [vmem:[#allocation3] sm:$0x1] }
 0x239   : > { %v388_v52 = vsel %vm387_vm5, %v386_v51, 0.0 }
 0x23a   : > { %389 = vadd.xlane.f32.xlu0 %v388_v52  ;;  %v391_v53 = vld [vmem:[#allocation4] sm:$0xf]  ;;  %v395_v54 = vld [vmem:[#allocation5] sm:$0xf] }
 0x23b   : > { %v392_v55 = vsel %vm237_vm1, %v391_v53, 0.0  ;;  %v396_v56 = vsel %vm237_vm1, %v395_v54, 0.0 }
 0x23c   : > { %393 = vadd.xlane.f32.xlu1 %v392_v55 }
 0x23e   : > { %397 = vadd.xlane.f32.xlu0 %v396_v56 }
 0x2c7   : > { %v390_v57 = vpop.xlane.xlu0 %389 }
 0x2c8   : > { %619 = vrcp.f32 %v390_v57 }
 0x2c9   : > { %v394_v60 = vpop.xlane.xlu1 %393 }
 0x2cb   : > { %v398_v62 = vpop.xlane.xlu0 %397 }
 0x2d2   : > { %v620_v58 = vpop.eup %619 }
 0x2d3   : > { %v404_v59 = vrot.slane %v620_v58, %v345_v29 }
 0x2d5   : > { %v405_v61 = vmul.f32 %v404_v59, %v394_v60  ;;  %v406_v0 = vmul.f32 %v404_v59, %v398_v62 }
 0x2d7   : > { %v407_v63 = vmul.f32 %v405_v61, %v405_v61 }
 0x2d9   : > { %v408_v1 = vsub.f32 %v406_v0, %v407_v63 }
 0x2db   : > { %v409_v2 = vmax.f32 %v408_v1, 1e-07 }
 0x2dd   : > { %621 = vrsqrt.f32 %v409_v2  ;;  %vm412_vm6 = vcmp.eq.f32.partialorder %v409_v2, inf  ;;  %v415_v5 = vand.u32 2147483648, %v409_v2  ;;  %vm414_vm7 = vcmp.eq.f32.partialorder %v409_v2, 0.0 }
 0x2e7   : > { %v622_v3 = vpop.eup %621 }
 0x2e8   : > { %v411_v4 = vmul.f32 %v622_v3, %v409_v2 }
 0x2ea   : > { %v413_v6 = vsel %vm412_vm6, %v409_v2, %v411_v4 }
 0x2eb   : > { %v416_v7 = vsel %vm414_vm7, %v415_v5, %v413_v6 }
 0x2ec   : > { %v418_v8 = vrot.slane %v416_v7, 4 }
 0x2ee   : > { %v420_v9 = vsel %vm237_vm1, %v405_v61, %v418_v8 }
 0x2ef   : > { %421 = vxpose.xlu0.b32.start.end [1/1] (short) (narrow) %v420_v9, 8 }
 0x36f   : > { %v437_v10 = vpop.trf.xlu0 }
 0x370   : > { %454 = vst.msk [vmem:[%s207_s22] sm:$0x1] %vm453_vm8, %v437_v10 }
 0x371   : > { %636 = shalt.err (!%p633_p5)
}
 0x372   : > { %s637_s9 = scalar_lea.hbm %s813_s30, 16  ;;  %s641_s12 = scalar_lea.hbm %s864_s4, 32 }
 0x373   : > { %p638_p6 = scmp.ne.s32.totalorder %s813_s30, %s637_s9  ;;  %p642_p10 = scmp.lt.u32.totalorder %s813_s30, %s864_s4 }
 0x374   : > { %p643_p11 = scmp.lt.u32.totalorder %s641_s12, %s637_s9  ;;  %p645_p13 = scmp.lt.u32.totalorder %s637_s9, %s813_s30 }
 0x375   : > { %p639_p7 = pnand %p638_p6, %p773_p4 }
 0x376   : > { %p644_p12 = por %p643_p11, %p642_p10 }
 0x377   : > { %p640_p9 = pneg %p639_p7 }
 0x378   : > { %p646_p0 = por %p645_p13, %p644_p12 }
 0x37a   : > { %p647_p1 = pnand %p646_p0, %p640_p9 }
 0x37c   : > { %650 = shalt.err (!%p647_p1)
}
 0x37d   : > { %552 = dma.vmem_to_hbm [thread:$0]  (%p773_p4), %s815_s24, 16, %s813_s30, %s456_s5  }
 0x37e PF: > { %p558_p2 = scmp.ge.s32.totalorder %s701_s20, 2  ;;  %s480_s21 = sand.u32 1, %s681_s15  }
 0x37f   : > { %s481_s22 = scalar_lea.sflag [#allocation7], %s480_s21 }
 0x380   : > { %p555_p3 = pnand %p558_p2, %p780_p8 }
 0x382   : > { %676 = dma.done.wait (!%p555_p3), %s481_s22, 16  }
 0x383   : > { %678 = vsyncadd (!%p555_p3), %s481_s22, 4294967280  ;;  %s17_s20 = sadd.s32 1, %s701_s20   ;;  %s867_s15 = smov %s685_s16 }
 0x384   : > { %p14_p5 = scmp.ge.s32.totalorder %s17_s20, 4   ;;  %s868_s16 = smov %s689_s17 }
 0x385   : > { %s869_s17 = smov %s786_s28  ;;  %s870_s18 = smov %s697_s19 }
 0x386   : > { %s871_s19 = smov %s873_s23  ;;  %16 = sbr.rel (!%p14_p5) target bundleno = 4 (0x4), region = 79 }
 0x38d   :  { %485 = vsyncpa [#allocation7], 1 }
 0x38e   :  { %487 = vsyncpa [#allocation7 + $0x1], 1 }

// kernel: tpu_custom_call.1
= control target key start
LH: loop header
LB: loop body
LE: loop exit
PB: predicated region body
PF: predicated region fallthrough
CT: control target
= control target key end

     0   :  { %9 = vsyncpa [#allocation7], 0  ;;  %s860_s0 = inlined_call_operand.vmem [shape: f32[2,4,128], index: 0, kind: input, shape index: {}]   ;;  %s861_s1 = inlined_call_operand.vmem [shape: f32[8,4], index: 1, kind: input, shape index: {}]   ;;  %s862_s2 = inlined_call_operand.vmem [shape: f32[8,1], index: 2, kind: input, shape index: {}]   ;;  %s863_s3 = inlined_call_operand.vmem [shape: f32[8,1], index: 3, kind: input, shape index: {}]   ;;  %s864_s4 = inlined_call_operand.hbm [shape: f32[2,1,8], index: 4, kind: output, shape index: {}]  }
   0x1   :  { %11 = vsyncpa [#allocation7 + $0x1], 0  ;;  %s733_s15 = smov 0   ;;  %s735_s16 = smov 0  }
   0x2   :  { %s737_s17 = smov 0   ;;  %s739_s18 = smov 0  }
   0x3   :  { %s741_s19 = smov 0   ;;  %s743_s20 = smov 0  }
   0x4 LB: > { %s534_s21 = sadd.s32 4294967295, %s701_s20   ;;  %s535_s22 = sadd.s32 4294967294, %s701_s20   ;;  %s701_s20 = sphi %s743_s20, %s17_s20   ;;  %s697_s19 = sphi %s741_s19, %s871_s19   ;;  %s693_s18 = sphi %s739_s18, %s870_s18   ;;  %s689_s17 = sphi %s737_s17, %s869_s17   ;;  %s685_s16 = sphi %s735_s16, %s868_s16   ;;  %s681_s15 = sphi %s733_s15, %s867_s15  }
   0x5   : > { %s29_s23 = sadd.s32 1, %s697_s19  ;;  %s127_s24 = sadd.s32 1, %s689_s17 }
   0x6   : > { %p31_p0 = scmp.ge.s32.totalorder %s29_s23, 2  ;;  %p137_p1 = scmp.ne.s32.totalorder %s689_s17, %s685_s16 }
   0x7   : > { %p138_p2 = scmp.eq.s32.totalorder %s534_s21, 1  ;;  %p143_p3 = scmp.ne.s32.totalorder %s685_s16, %s681_s15 }
   0x8   : > { %s873_s23 = smov (%p31_p0, %s29_s23), 0  ;;  %p144_p5 = scmp.eq.s32.totalorder %s535_s22, 1 }
   0x9   : > { %p773_p4 = por %p138_p2, %p137_p1  ;;  %s124_s26 = ssub.s32 %s697_s19, %s873_s23 }
   0xa   : > { %p538_p6 = scmp.ge.s32.totalorder %s701_s20, 1  ;;  %p125_p7 = scmp.eq.s32.totalorder %s124_s26, 0 }
   0xb   : > { %p780_p8 = por %p144_p5, %p143_p3  ;;  %p181_p9 = scmp.lt.s32.totalorder %s701_s20, 3 }
   0xc   : > { %s786_s28 = scalar_select %p125_p7, %s689_s17, %s127_s24  }
   0xd   : > { %p182_p10 = pnand %p538_p6, %p181_p9 }
   0xe   : > { %p208_p11 = scmp.lt.s32.totalorder (!%p182_p10), %s693_s18, 1  ;;  %v703_v0 = vmov (!%p182_p10), 0.0   ;;  %vm704_vm0 = vmmov (!%p182_p10), 0   ;;  %v226_v1 = vld [vmem:[%s862_s2] sm:$0xff] (!%p182_p10)  ;;  %v705_v2 = vmov (!%p182_p10), 0   ;;  %vm237_vm1 = vcmask (!%p182_p10), 1043456  }
   0xf   : > { %185 = sbr.rel (%p182_p10) target bundleno = 894 (0x37e), region = 36  ;;  %547 = vmatprep.subr.mxu0 (!%p182_p10), %v703_v0  ;;  %221 = vst [vmem:[#allocation3] sm:$0x1] (!%p182_p10), %v703_v0  ;;  %222 = vst [vmem:[#allocation4] sm:$0xf] (!%p182_p10), %v703_v0  ;;  %549 = vmatprep.mubr.msk.f32.mxu0 (!%p182_p10), %vm704_vm0, %v703_v0  ;;  %v227_v3 = vld [vmem:[%s863_s3] sm:$0xff] (!%p182_p10)  ;;  %v325_v15 = vlaneseq (!%p182_p10) }
  0x10   : > { %223 = vst [vmem:[#allocation5] sm:$0xf] (!%p182_p10), %v703_v0  ;;  %611 = vset.pattern.permute.xlu0 (!%p182_p10), %v705_v2  ;;  %612 = vset.pattern.permute.xlu1 (!%p182_p10), %v705_v2  ;;  %v225_v4 = vld [vmem:[%s861_s1] sm:$0xff] (!%p182_p10)  ;;  %vm233_vm2 = vcmask (!%p182_p10), 31744   ;;  %vm219_vm3 = vcmask (!%p182_p10), 0   ;;  %v706_v6 = vmov (!%p182_p10), -inf  }
  0x11   : > { %230 = vperm.xlu0 (!%p182_p10), %611, %v226_v1   ;;  %220 = vst.msk [vmem:[#allocation2] sm:$0x1] (!%p182_p10), %vm219_vm3, %v706_v6  ;;  %v326_v18 = vand.u32 (!%p182_p10), 127, %v325_v15  ;;  %v344_v28 = vshrl.u32 (!%p182_p10), %v325_v15, 7  ;;  %vm387_vm5 = vcmask (!%p182_p10), 1040384   ;;  %s206_s14 = sand.u32 (!%p182_p10), 1, %s685_s16  }
  0x12   : > { %s542_s21 = sshll.u32 (!%p182_p10), %s693_s18, 4  ;;  %s207_s22 = scalar_lea.vmem (!%p182_p10), [#allocation6], %s206_s14  ;;  %vm453_vm8 = vcmask (!%p182_p10), 57344  }
  0x13   : > { %vm329_vm4 = vcmp.lt.s32.totalorder (!%p182_p10), %v326_v18, 16  ;;  %v345_v29 = vsub.s32 (!%p182_p10), 0, %v344_v28  ;;  %s468_s24 = sshll.u32 (!%p182_p10), %s207_s22, 4  ;;  %s813_s30 = scalar_lea.hbm (!%p182_p10), %s864_s4, %s542_s21  ;;  %s815_s24 = int_to_ptr.vmem [resolvable:$true] %s468_s24 }
  0x15   : > { %314 = vperm.xlu0 (!%p182_p10), %611, %v227_v3  }
  0x16   : > { %s209_s5 = scalar_select %p208_p11, %s693_s18, 1  ;;  %v352_v36 = vld [vmem:[#allocation3] sm:$0x1]  ;;  %v365_v40 = vld [vmem:[#allocation4] sm:$0xf] }
  0x17   : > { %v377_v41 = vld [vmem:[#allocation5] sm:$0xf]  ;;  %s707_s18 = smov [#allocation6]  }
  0x18   : > { %s539_s6 = sshll.u32 %s209_s5, 2  ;;  %v331_v23 = vld [vmem:[#allocation2] sm:$0x1]  ;;  %s456_s5 = scalar_lea.sflag [#allocation7], %s206_s14 }
  0x19   : > { %s214_s11 = scalar_lea.vmem %s860_s0, %s539_s6  ;;  %s623_s6 = scalar_lea.vmem %s815_s24, 16 }
  0x1a   : > { %v224_v5 = vld [vmem:[%s214_s11] sm:$0xf]  ;;  %p624_p12 = scmp.ne.s32.totalorder %s815_s24, %s623_s6  ;;  %s627_s7 = sshll.u32 %s707_s18, 4  ;;  %s628_s7 = int_to_ptr.vmem [resolvable:$false] %s627_s7 }
  0x1b   : > { %548 = vmatpush3.msk.msra.mxu0 %vm237_vm1, %v224_v5  ;;  %s629_s8 = scalar_lea.vmem %s628_s7, 32  ;;  %p630_p1 = scmp.lt.s32.totalorder %s815_s24, %s628_s7 }
  0x1c   : > { %550 = vmatmul.mubr.msk.f32.vlgmr.msra.gmra.mrb[0].mxu0 %vm233_vm2, %v225_v4  ;;  %p625_p13 = pnand %p624_p12, %p773_p4  ;;  %p631_p2 = scmp.lt.s32.totalorder %s629_s8, %s623_s6 }
  0x1e   : > { %p626_p0 = pneg %p625_p13  ;;  %p632_p3 = por %p631_p2, %p630_p1 }
  0x20   : > { %p633_p5 = pnand %p632_p3, %p626_p0 }
  0x90   : > { %v231_v7 = vpop.permute.xlu0 %230 }
  0x94   : > { %v315_v12 = vpop.permute.xlu0 %314 }
  0xef   : > { %v307_v8 = vpop.f32.mrb[0].mxu0 }
  0xf0   : > { %v308_v9 = vadd.f32 %v307_v8, %v231_v7  ;;  %v551_v10 = vpop.f32.mrb[1].mxu0 }
  0xf2   : > { %613 = vtanh.f32 %v308_v9 }
  0xfc   : > { %v614_v11 = vpop.eup %613 }
  0xfd   : > { %v317_v13 = vmul.f32 %v614_v11, %v315_v12 }
  0xff   : > { %v318_v14 = vrot.slane %v317_v13, 4 }
 0x101   : > { %v319_v16 = vadd.f32 %v318_v14, %v317_v13 }
 0x103   : > { %v320_v17 = vrot.slane %v319_v16, 2 }
 0x105   : > { %v321_v19 = vadd.f32 %v320_v17, %v319_v16 }
 0x107   : > { %v322_v20 = vrot.slane %v321_v19, 1 }
 0x109   : > { %v323_v21 = vadd.f32 %v322_v20, %v321_v19 }
 0x10b   : > { %v330_v22 = vsel %vm329_vm4, %v323_v21, -inf }
 0x10c   : > { %332 = vmax.xlane.f32.xlu1 %v330_v22 }
 0x199   : > { %v333_v24 = vpop.xlane.xlu1 %332 }
 0x19a   : > { %v334_v25 = vmax.f32 %v331_v23, %v333_v24 }
 0x19c   : > { %v335_v26 = vsub.f32 %v331_v23, %v334_v25  ;;  %382 = vst.msk [vmem:[#allocation2] sm:$0x1] %vm219_vm3, %v334_v25  ;;  %340 = vperm.xlu1 %612, %v334_v25  }
 0x19e   : > { %v336_v27 = vmul.f32 1.442695, %v335_v26 }
 0x1a0   : > { %615 = vpow2.f32 %v336_v27 }
 0x1aa   : > { %v616_v30 = vpop.eup %615 }
 0x1ab   : > { %355 = vperm.xlu0 %611, %v616_v30   ;;  %v369_v31 = vrot.slane %v616_v30, %v345_v29 }
 0x1af   : > { %371 = vperm.xlu0 %611, %v369_v31  }
 0x21b   : > { %v341_v32 = vpop.permute.xlu1 %340 }
 0x21c   : > { %v346_v33 = vrot.slane %v341_v32, %v345_v29 }
 0x21e   : > { %v347_v34 = vsub.f32 %v330_v22, %v346_v33 }
 0x220   : > { %v348_v35 = vmul.f32 1.442695, %v347_v34 }
 0x222   : > { %617 = vpow2.f32 %v348_v35 }
 0x22a   : > { %v356_v37 = vpop.permute.xlu0 %355 }
 0x22b   : > { %v361_v38 = vrot.slane %v356_v37, %v345_v29 }
 0x22c   : > { %v618_v39 = vpop.eup %617 }
 0x22d   : > { %v362_v42 = vmul.f32 %v361_v38, %v352_v36  ;;  %v350_v43 = vmul.f32 %v618_v39, %v224_v5 }
 0x22e   : > { %v372_v44 = vpop.permute.xlu0 %371 }
 0x22f   : > { %v363_v45 = vadd.f32 %v618_v39, %v362_v42  ;;  %v351_v46 = vmul.f32 %v350_v43, %v224_v5  ;;  %v374_v47 = vmul.f32 %v372_v44, %v365_v40  ;;  %v378_v48 = vmul.f32 %v377_v41, %v372_v44 }
 0x231   : > { %364 = vst [vmem:[#allocation3] sm:$0x1] %v363_v45  ;;  %v375_v49 = vadd.f32 %v374_v47, %v350_v43  ;;  %v379_v50 = vadd.f32 %v378_v48, %v351_v46 }
 0x233   : > { %376 = vst [vmem:[#allocation4] sm:$0xf] %v375_v49  ;;  %380 = vst [vmem:[#allocation5] sm:$0xf] %v379_v50 }
 0x238   : > { %v386_v51 = vld [vmem:[#allocation3] sm:$0x1] }
 0x239   : > { %v388_v52 = vsel %vm387_vm5, %v386_v51, 0.0 }
 0x23a   : > { %389 = vadd.xlane.f32.xlu0 %v388_v52  ;;  %v391_v53 = vld [vmem:[#allocation4] sm:$0xf]  ;;  %v395_v54 = vld [vmem:[#allocation5] sm:$0xf] }
 0x23b   : > { %v392_v55 = vsel %vm237_vm1, %v391_v53, 0.0  ;;  %v396_v56 = vsel %vm237_vm1, %v395_v54, 0.0 }
 0x23c   : > { %393 = vadd.xlane.f32.xlu1 %v392_v55 }
 0x23e   : > { %397 = vadd.xlane.f32.xlu0 %v396_v56 }
 0x2c7   : > { %v390_v57 = vpop.xlane.xlu0 %389 }
 0x2c8   : > { %619 = vrcp.f32 %v390_v57 }
 0x2c9   : > { %v394_v60 = vpop.xlane.xlu1 %393 }
 0x2cb   : > { %v398_v62 = vpop.xlane.xlu0 %397 }
 0x2d2   : > { %v620_v58 = vpop.eup %619 }
 0x2d3   : > { %v404_v59 = vrot.slane %v620_v58, %v345_v29 }
 0x2d5   : > { %v405_v61 = vmul.f32 %v404_v59, %v394_v60  ;;  %v406_v0 = vmul.f32 %v404_v59, %v398_v62 }
 0x2d7   : > { %v407_v63 = vmul.f32 %v405_v61, %v405_v61 }
 0x2d9   : > { %v408_v1 = vsub.f32 %v406_v0, %v407_v63 }
 0x2db   : > { %v409_v2 = vmax.f32 %v408_v1, 1e-07 }
 0x2dd   : > { %621 = vrsqrt.f32 %v409_v2  ;;  %vm412_vm6 = vcmp.eq.f32.partialorder %v409_v2, inf  ;;  %v415_v5 = vand.u32 2147483648, %v409_v2  ;;  %vm414_vm7 = vcmp.eq.f32.partialorder %v409_v2, 0.0 }
 0x2e7   : > { %v622_v3 = vpop.eup %621 }
 0x2e8   : > { %v411_v4 = vmul.f32 %v622_v3, %v409_v2 }
 0x2ea   : > { %v413_v6 = vsel %vm412_vm6, %v409_v2, %v411_v4 }
 0x2eb   : > { %v416_v7 = vsel %vm414_vm7, %v415_v5, %v413_v6 }
 0x2ec   : > { %v418_v8 = vrot.slane %v416_v7, 4 }
 0x2ee   : > { %v420_v9 = vsel %vm237_vm1, %v405_v61, %v418_v8 }
 0x2ef   : > { %421 = vxpose.xlu0.b32.start.end [1/1] (short) (narrow) %v420_v9, 8 }
 0x36f   : > { %v437_v10 = vpop.trf.xlu0 }
 0x370   : > { %454 = vst.msk [vmem:[%s207_s22] sm:$0x1] %vm453_vm8, %v437_v10 }
 0x371   : > { %636 = shalt.err (!%p633_p5)
}
 0x372   : > { %s637_s9 = scalar_lea.hbm %s813_s30, 16  ;;  %s641_s12 = scalar_lea.hbm %s864_s4, 32 }
 0x373   : > { %p638_p6 = scmp.ne.s32.totalorder %s813_s30, %s637_s9  ;;  %p642_p10 = scmp.lt.u32.totalorder %s813_s30, %s864_s4 }
 0x374   : > { %p643_p11 = scmp.lt.u32.totalorder %s641_s12, %s637_s9  ;;  %p645_p13 = scmp.lt.u32.totalorder %s637_s9, %s813_s30 }
 0x375   : > { %p639_p7 = pnand %p638_p6, %p773_p4 }
 0x376   : > { %p644_p12 = por %p643_p11, %p642_p10 }
 0x377   : > { %p640_p9 = pneg %p639_p7 }
 0x378   : > { %p646_p0 = por %p645_p13, %p644_p12 }
 0x37a   : > { %p647_p1 = pnand %p646_p0, %p640_p9 }
 0x37c   : > { %650 = shalt.err (!%p647_p1)
}
 0x37d   : > { %552 = dma.vmem_to_hbm [thread:$0]  (%p773_p4), %s815_s24, 16, %s813_s30, %s456_s5  }
 0x37e PF: > { %p558_p2 = scmp.ge.s32.totalorder %s701_s20, 2  ;;  %s480_s21 = sand.u32 1, %s681_s15  }
 0x37f   : > { %s481_s22 = scalar_lea.sflag [#allocation7], %s480_s21 }
 0x380   : > { %p555_p3 = pnand %p558_p2, %p780_p8 }
 0x382   : > { %676 = dma.done.wait (!%p555_p3), %s481_s22, 16  }
 0x383   : > { %678 = vsyncadd (!%p555_p3), %s481_s22, 4294967280  ;;  %s17_s20 = sadd.s32 1, %s701_s20   ;;  %s867_s15 = smov %s685_s16 }
 0x384   : > { %p14_p5 = scmp.ge.s32.totalorder %s17_s20, 4   ;;  %s868_s16 = smov %s689_s17 }
 0x385   : > { %s869_s17 = smov %s786_s28  ;;  %s870_s18 = smov %s697_s19 }
 0x386   : > { %s871_s19 = smov %s873_s23  ;;  %16 = sbr.rel (!%p14_p5) target bundleno = 4 (0x4), region = 79 }
 0x38d   :  { %485 = vsyncpa [#allocation7], 1 }
 0x38e   :  { %487 = vsyncpa [#allocation7 + $0x1], 1 }

</bundles_post_ra>
